<compile_context>
chip_gen: v6e
topology: v6e:2x2x1
jax: 0.10.0
libtpu: 0.0.40
codegen_flags: <defaults>
</compile_context>

<pallas_src>
import functools

import jax
import jax.numpy as jnp
from jax.experimental import pallas as pl
from jax.experimental.pallas import tpu as pltpu


def _center_loss_kernel(lab_ref, x_ref, c_ref, out_ref, *,
                        inv_feat_dim, num_classes, tile_b):
    """One batch tile of TB rows.

    lab_ref : VMEM (TB, 1) int32   -- labels for this tile
    x_ref   : VMEM (TB, D)         -- feature tile
    c_ref   : VMEM (C, D)          -- centers, resident across all grid steps
    out_ref : VMEM (8, 128) f32    -- broadcast of this tile's partial sum
    """
    labels = lab_ref[...]                                            # (TB, 1)
    class_iota = jax.lax.broadcasted_iota(
        jnp.int32, (tile_b, num_classes), 1)                         # (TB, C)
    onehot = (labels == class_iota).astype(c_ref.dtype)              # (TB, C)

    # Gather c[labels] via MXU: exact (0/1 weights), no dynamic indexing.
    cg = jnp.dot(onehot, c_ref[...],
                 preferred_element_type=jnp.float32)                 # (TB, D)

    d = x_ref[...].astype(jnp.float32) - cg                          # (TB, D)
    per_row = jnp.sum(d * d, axis=1, keepdims=True) * inv_feat_dim   # (TB, 1)
    per_row = jnp.clip(per_row, 1e-12, 1e12)

    tile_sum = jnp.sum(per_row)                                      # scalar
    out_ref[...] = jnp.broadcast_to(tile_sum, out_ref.shape).astype(jnp.float32)


def _pick_tile_b(B, D):
    """Largest multiple-of-8 divisor of B under a v7x-safe VMEM budget."""
    if B % 8 != 0:
        return B                       # small/odd batch: single full tile
    # ~12 MiB per x buffer keeps (x double-buffer + temps) well inside v7x VMEM.
    max_rows = max(8, min(512, ((12 << 20) // max(D * 4, 1)) // 8 * 8))
    tb, cand = 8, 8
    while cand <= min(B, max_rows):
        if B % cand == 0:
            tb = cand
        cand += 8
    # Keep >= 2 grid steps when possible so v7x's 2 TCs can split the batch.
    if tb == B and B >= 16:
        best, c = 8, 8
        while c <= B // 2:
            if B % c == 0:
                best = c
            c += 8
        tb = best
    return tb


def center_loss(x, labels, centers, *, tile_b=None):
    """x: (B, D) float, labels: (B,) int, centers: (C, D) float -> scalar f32."""
    B, D = x.shape
    C, D2 = centers.shape
    assert D == D2
    if tile_b is None:
        tile_b = _pick_tile_b(B, D)
    assert B % tile_b == 0
    num_tiles = B // tile_b

    labels2d = labels.astype(jnp.int32).reshape(B, 1)
    itemsize = jnp.dtype(x.dtype).itemsize

    # Explicit VMEM budget (double-buffered x/labels, resident centers,
    # one-hot + gathered-centers temporaries, output block, compiler slack).
    vmem_need = (2 * tile_b * D * itemsize            # x tiles
                 + 2 * C * D * centers.dtype.itemsize  # centers (resident)
                 + 2 * tile_b * 4                      # labels
                 + 2 * 8 * 128 * 4                     # output block
                 + tile_b * C * 4 + 2 * tile_b * D * 4  # onehot / cg / diff
                 + (4 << 20))
    vmem_limit = int(min(max(vmem_need, 16 << 20), 64 << 20))

    partial = pl.pallas_call(
        functools.partial(_center_loss_kernel,
                          inv_feat_dim=1.0 / float(D),
                          num_classes=C, tile_b=tile_b),
        out_shape=jax.ShapeDtypeStruct((num_tiles * 8, 128), jnp.float32),
        grid_spec=pltpu.PrefetchScalarGridSpec(
            num_scalar_prefetch=0,
            grid=(num_tiles,),
            in_specs=[
                pl.BlockSpec((tile_b, 1), lambda i: (i, 0)),   # labels tile
                pl.BlockSpec((tile_b, D), lambda i: (i, 0)),   # x tile
                pl.BlockSpec((C, D), lambda i: (0, 0)),        # centers, resident
            ],
            out_specs=pl.BlockSpec((8, 128), lambda i: (i, 0)),
        ),
        compiler_params=pltpu.CompilerParams(
            dimension_semantics=("parallel",),    # v7x: split batch across 2 TCs
            vmem_limit_bytes=vmem_limit,
        ),
    )(labels2d, x, centers)

    # Each tile wrote its partial sum broadcast over an (8, 128) block.
    tile_sums = partial.reshape(num_tiles, 8, 128)[:, 0, 0]
    return jnp.sum(tile_sums) / B


def center_loss_ref(x, labels, centers):
    """Pure-JAX reference mirroring the PyTorch forward exactly."""
    B, D = x.shape
    x = x.astype(jnp.float32)
    c = centers.astype(jnp.float32)
    distmat = (
        jnp.sum(x * x, axis=1, keepdims=True)
        + jnp.sum(c * c, axis=1, keepdims=True).T
        - 2.0 * x @ c.T
    ) / D
    picked = distmat[jnp.arange(B), labels]
    return jnp.mean(jnp.clip(picked, 1e-12, 1e12))


if __name__ == "__main__":
    # Small shapes consistent with the module's forward.
    batch_size, num_classes, feat_dim = 16, 16, 32

    key = jax.random.PRNGKey(0)
    kx, kc, kl = jax.random.split(key, 3)

    x = jax.random.normal(kx, (batch_size, feat_dim), dtype=jnp.float32)
    # Deterministic "parameter" init (torch.randn equivalent).
    centers = jax.random.normal(kc, (num_classes, feat_dim), dtype=jnp.float32)
    labels = jax.random.randint(kl, (batch_size,), 0, num_classes, dtype=jnp.int32)

    loss = jax.block_until_ready(center_loss(x, labels, centers))
    ref = jax.block_until_ready(center_loss_ref(x, labels, centers))

    assert jnp.allclose(loss, ref, rtol=1e-5, atol=1e-5), (loss, ref)
    print("KERNEL_OK")
</pallas_src>

<mosaic_0001>
module attributes {stable_mosaic.version = 11 : i64} {
  func.func @_center_loss_kernel(%arg0: i32, %arg1: memref<8x1xi32, #tpu.memory_space<vmem>>, %arg2: memref<8x32xf32, #tpu.memory_space<vmem>>, %arg3: memref<16x32xf32, #tpu.memory_space<vmem>>, %arg4: memref<8x128xf32, #tpu.memory_space<vmem>>) attributes {dimension_semantics = [#tpu.dimension_semantics<parallel>], iteration_bounds = array<i64: 2>, scalar_prefetch = 0 : i64, scratch_operands = 0 : i64, tpu.core_type = #tpu.core_type<tc>, window_params = [{transform_indices = @transform_0, window_bounds = array<i64: 8, 1>}, {transform_indices = @transform_1, window_bounds = array<i64: 8, 32>}, {pipeline_mode = #tpu.pipeline_mode<synchronous>, transform_indices = @transform_2, window_bounds = array<i64: 16, 32>}, {transform_indices = @transform_3, window_bounds = array<i64: 8, 128>}]} {
    %c0 = arith.constant 0 : index
    %c0_0 = arith.constant 0 : index
    %0 = vector.load %arg1[%c0, %c0_0] : memref<8x1xi32, #tpu.memory_space<vmem>>, vector<8x1xi32>
    %1 = tpu.iota {dimensions = array<i32: 1>} : vector<8x16xi32>
    %2 = vector.broadcast %0 : vector<8x1xi32> to vector<8x16xi32>
    %3 = arith.cmpi eq, %2, %1 : vector<8x16xi32>
    %4 = arith.extui %3 : vector<8x16xi1> to vector<8x16xi32>
    %5 = arith.sitofp %4 : vector<8x16xi32> to vector<8x16xf32>
    %c0_1 = arith.constant 0 : index
    %c0_2 = arith.constant 0 : index
    %6 = vector.load %arg3[%c0_1, %c0_2] : memref<16x32xf32, #tpu.memory_space<vmem>>, vector<16x32xf32>
    %cst = arith.constant dense<0.000000e+00> : vector<8x32xf32>
    %7 = tpu.matmul %5, %6, %cst {dimension_numbers = #tpu.dot_dimension_numbers<[1], [0], [0], [1], [0, 0, 1, 1], [], []>} : vector<8x16xf32>, vector<16x32xf32>, vector<8x32xf32> -> vector<8x32xf32>
    %c0_3 = arith.constant 0 : index
    %c0_4 = arith.constant 0 : index
    %8 = vector.load %arg2[%c0_3, %c0_4] : memref<8x32xf32, #tpu.memory_space<vmem>>, vector<8x32xf32>
    %9 = arith.subf %8, %7 : vector<8x32xf32>
    %10 = arith.mulf %9, %9 : vector<8x32xf32>
    %cst_5 = arith.constant dense<0.000000e+00> : vector<8xf32>
    %11 = vector.multi_reduction <add>, %10, %cst_5 [1] : vector<8x32xf32> to vector<8xf32>
    %12 = vector.shape_cast %11 : vector<8xf32> to vector<8x1xf32>
    %cst_6 = arith.constant 3.125000e-02 : f32
    %13 = vector.broadcast %cst_6 : f32 to vector<8x1xf32>
    %14 = arith.mulf %12, %13 : vector<8x1xf32>
    %cst_7 = arith.constant 9.99999996E-13 : f32
    %cst_8 = arith.constant 9.99999995E+11 : f32
    %15 = vector.broadcast %cst_7 : f32 to vector<8x1xf32>
    %16 = arith.maximumf %15, %14 : vector<8x1xf32>
    %17 = vector.broadcast %cst_8 : f32 to vector<8x1xf32>
    %18 = arith.minimumf %17, %16 : vector<8x1xf32>
    %19 = vector.shape_cast %18 : vector<8x1xf32> to vector<1x8x1xf32>
    %cst_9 = arith.constant dense<0.000000e+00> : vector<1xf32>
    %20 = vector.multi_reduction <add>, %19, %cst_9 [1, 2] : vector<1x8x1xf32> to vector<1xf32>
    %21 = vector.shape_cast %20 : vector<1xf32> to vector<1x1x1xf32>
    %22 = vector.extract %21[0, 0, 0] : f32 from vector<1x1x1xf32>
    %23 = vector.broadcast %22 : f32 to vector<8x128xf32>
    %c0_10 = arith.constant 0 : index
    %c0_11 = arith.constant 0 : index
    %24 = vector.load %arg4[%c0_10, %c0_11] : memref<8x128xf32, #tpu.memory_space<vmem>>, vector<8x128xf32>
    tpu.vector_store %arg4[%c0_10, %c0_11], %23 {strides = array<i32>} : memref<8x128xf32, #tpu.memory_space<vmem>>, vector<8x128xf32>,
    return
  }
  func.func @transform_0(%arg0: i32) -> (i32, i32) {
    %c0_i32 = arith.constant 0 : i32
    %c0_i32_0 = arith.constant 0 : i32
    return %arg0, %c0_i32 : i32, i32
  }
  func.func @transform_1(%arg0: i32) -> (i32, i32) {
    %c0_i32 = arith.constant 0 : i32
    %c0_i32_0 = arith.constant 0 : i32
    return %arg0, %c0_i32 : i32, i32
  }
  func.func @transform_2(%arg0: i32) -> (i32, i32) {
    %c0_i32 = arith.constant 0 : i32
    %c0_i32_0 = arith.constant 0 : i32
    %c0_i32_1 = arith.constant 0 : i32
    return %c0_i32, %c0_i32_0 : i32, i32
  }
  func.func @transform_3(%arg0: i32) -> (i32, i32) {
    %c0_i32 = arith.constant 0 : i32
    %c0_i32_0 = arith.constant 0 : i32
    return %arg0, %c0_i32 : i32, i32
  }
}

</mosaic_0001>

<bundles_post_ra>
// kernel: tpu_custom_call.1
= control target key start
LH: loop header
LB: loop body
LE: loop exit
PB: predicated region body
PF: predicated region fallthrough
CT: control target
= control target key end

     0   :  { %8 = vsyncpa [#allocation3], 0  ;;  %s719_s0 = inlined_call_operand.vmem [shape: s32[16,1], index: 0, kind: input, shape index: {}]   ;;  %s720_s1 = inlined_call_operand.vmem [shape: f32[16,32], index: 1, kind: input, shape index: {}]   ;;  %s721_s2 = inlined_call_operand.hbm [shape: f32[16,32], index: 2, kind: input, shape index: {}]   ;;  %s722_s3 = inlined_call_operand.hbm [shape: f32[16,128], index: 3, kind: output, shape index: {}]  }
   0x1   :  { %9 = vsyncpa [#allocation4], 0 }
   0x2   :  { %11 = vsyncpa [#allocation4 + $0x1], 0  ;;  %s605_s12 = smov 0   ;;  %s607_s13 = smov 0  }
   0x3   :  { %s609_s14 = smov 0   ;;  %s611_s15 = smov 0  }
   0x4 LB: > { %s626_s16 = sadd.s32 4294967295, %s576_s15   ;;  %s403_s17 = sadd.s32 4294967294, %s576_s15   ;;  %s576_s15 = sphi %s611_s15, %s730_s15   ;;  %s572_s14 = sphi %s609_s14, %s729_s14   ;;  %s568_s13 = sphi %s607_s13, %s728_s13   ;;  %s564_s12 = sphi %s605_s12, %s727_s12  }
   0x5   : > { %s630_s18 = sadd.s32 1, %s576_s15   ;;  %s97_s19 = sadd.s32 1, %s572_s14 }
   0x6   : > { %s94_s20 = ssub.s32 %s576_s15, %s630_s18  ;;  %p107_p0 = scmp.ne.s32.totalorder %s572_s14, %s568_s13 }
   0x7   : > { %p95_p1 = scmp.eq.s32.totalorder %s94_s20, 0  ;;  %p108_p2 = scmp.eq.s32.totalorder %s626_s16, 1 }
   0x8   : > { %p113_p3 = scmp.ne.s32.totalorder %s568_s13, %s564_s12  ;;  %p114_p4 = scmp.eq.s32.totalorder %s403_s17, 1 }
   0x9   : > { %s641_s21 = scalar_select %p95_p1, %s572_s14, %s97_s19  }
   0xa   : > { %p643_p5 = por %p108_p2, %p107_p0  ;;  %p647_p6 = por %p114_p4, %p113_p3 }
   0xb   : > { %p404_p7 = scmp.ge.s32.totalorder %s576_s15, 1  ;;  %p121_p8 = scmp.lt.s32.totalorder %s576_s15, 3 }
   0xc   : > { %s724_s23 = scalar_select %p647_p6, 1, 0 }
   0xd   : > { %p444_p9 = scmp.eq.s32.totalorder %s626_s16, 0  ;;  %p654_p10 = pnand %p404_p7, %p121_p8 }
   0xe   : > { %s578_s25 = smov [#allocation2]  }
   0xf   : > { %s133_s26 = sshll.u32 %s578_s25, 4  ;;  %p436_p11 = pneg %p654_p10  ;;  %s134_s26 = int_to_ptr.vmem [resolvable:$true] %s133_s26 }
  0x10   : > { %s497_s27 = scalar_lea.vmem %s134_s26, 256  ;;  %p505_p3 = scmp.lt.s32.totalorder %s134_s26, %s134_s26 }
  0x11   : > { %p437_p12 = pnand %p444_p9, %p436_p11  ;;  %p498_p0 = scmp.ne.s32.totalorder %s134_s26, %s497_s27 }
  0x12   : > { %p506_p4 = scmp.lt.s32.totalorder %s497_s27, %s497_s27 }
  0x13   : > { %p488_p13 = pneg %p437_p12 }
  0x14   : > { %p507_p6 = por %p506_p4, %p505_p3 }
  0x15   : > { %p500_p1 = pnand %p498_p0, %p488_p13 }
  0x17   : > { %p501_p2 = pneg %p500_p1 }
  0x19   : > { %p508_p7 = pnand %p507_p6, %p501_p2 }
  0x1b   : > { %511 = shalt.err (!%p508_p7)
}
  0x1c   : > { %s579_s28 = smov 128   ;;  %s580_s29 = smov 8  }
  0x1d   : > { %439 = dma.hbm_to_vmem [thread:$0]  (!%p437_p12), %s721_s2, 256, %s134_s26, [#allocation3], %s579_s28, %s579_s28, %s580_s29  }
  0x1e   : > { %163 = sbr.rel (%p654_p10) target bundleno = 726 (0x2d6), region = 32 }
  0x23   : > { %555 = dma.done.wait (%p444_p9), [#allocation3], 256  }
  0x24   : > { %557 = vsyncadd (%p444_p9), [#allocation3], 4294967040  ;;  %p190_p8 = scmp.lt.s32.totalorder %s626_s16, 1  ;;  %v581_v0 = vmov 0   ;;  %v582_v1 = vmov 0.0   ;;  %vm583_vm0 = vmmov 0   ;;  %v199_v5 = vlaneseq }
  0x25   : > { %485 = vset.pattern.permute.xlu0 %v581_v0  ;;  %421 = vmatprep.subr.mxu0 %v582_v1  ;;  %v208_v3 = vld [vmem:[#allocation2 + $0x8] sm:$0xff]  ;;  %v207_v4 = vld [vmem:[#allocation2] sm:$0xff]  ;;  %vm209_vm1 = vcmask 130048   ;;  %vm286_vm3 = vcmask 261120   ;;  %vm293_vm4 = vcmask 7168   ;;  %s187_s19 = sand.u32 1, %s568_s13  }
  0x26   : > { %s191_s5 = scalar_select %p190_p8, %s626_s16, 1  ;;  %425 = vmatprep.mubr.msk.f32.mxu0 %vm583_vm0, %v582_v1  ;;  %422 = vmatpush3.msra.mxu0 %v208_v3  ;;  %v200_v6 = vand.u32 127, %v199_v5 }
  0x27   : > { %423 = vmatprep.subr.mxu0 %v582_v1  ;;  %s409_s20 = sshll.u32 %s187_s19, 3  ;;  %s415_s26 = sshll.u32 %s626_s16, 7 }
  0x28   : > { %s410_s6 = sshll.u32 %s191_s5, 3  ;;  %424 = vmatpush3.msra.mxu0 %v207_v4  ;;  %s189_s24 = scalar_lea.vmem [#allocation5], %s409_s20 }
  0x29   : > { %s193_s9 = scalar_lea.vmem %s719_s0, %s410_s6  ;;  %s197_s17 = scalar_lea.vmem %s720_s1, %s410_s6 }
  0x2a   : > { %v198_v2 = vld [vmem:[%s193_s9] sm:$0xff]  ;;  %s320_s25 = sshll.u32 %s189_s24, 4  ;;  %s318_s30 = scalar_lea.hbm %s722_s3, %s415_s26  ;;  %s681_s25 = int_to_ptr.vmem [resolvable:$true] %s320_s25 }
  0x2b   : > { %202 = vperm.xlu0 %485, %v198_v2   ;;  %v283_v9 = vld [vmem:[%s197_s17] sm:$0xff]  ;;  %s307_s4 = scalar_lea.sflag [#allocation4], %s187_s19  ;;  %s512_s5 = scalar_lea.vmem %s681_s25, 128 }
  0x2c   : > { %p513_p6 = scmp.ne.s32.totalorder %s681_s25, %s512_s5  ;;  %s584_s6 = smov [#allocation5]  }
  0x2d   : > { %s516_s16 = sshll.u32 %s584_s6, 4  ;;  %s517_s16 = int_to_ptr.vmem [resolvable:$false] %s516_s16 }
  0x2e   : > { %p514_p9 = pnand %p513_p6, %p643_p5  ;;  %s518_s7 = scalar_lea.vmem %s517_s16, 256 }
  0x2f   : > { %p519_p11 = scmp.lt.s32.totalorder %s681_s25, %s517_s16  ;;  %p520_p12 = scmp.lt.s32.totalorder %s518_s7, %s512_s5 }
  0x30   : > { %p515_p10 = pneg %p514_p9 }
  0x31   : > { %p521_p13 = por %p520_p12, %p519_p11 }
  0x33   : > { %p522_p0 = pnand %p521_p13, %p515_p10 }
  0xa6   : > { %v203_v7 = vpop.permute.xlu0 %202 }
  0xa7   : > { %vm204_vm2 = vcmp.eq.s32.totalorder %v203_v7, %v200_v6 }
  0xa8   : > { %v412_v8 = vsel %vm204_vm2, 1.0, %v582_v1 }
  0xa9   : > { %426 = vmatmul.mubr.msk.f32.vlgmr.msra.gmra.mxu0 %vm209_vm1, %v412_v8 }
 0x169   : > { %v279_v10 = vpop.f32.mrf.mxu0 }
 0x16a   : > { %v284_v11 = vsub.f32 %v283_v9, %v279_v10 }
 0x16b   : > { %v427_v12 = vpop.f32.mrf.mxu0 }
 0x16c   : > { %v285_v13 = vmul.f32 %v284_v11, %v284_v11 }
 0x16e   : > { %v287_v14 = vsel %vm286_vm3, %v285_v13, 0.0 }
 0x16f   : > { %288 = vadd.xlane.f32.xlu0 %v287_v14 }
 0x1f8   : > { %v289_v15 = vpop.xlane.xlu0 %288 }
 0x1f9   : > { %v290_v16 = vmul.f32 0.03125, %v289_v15 }
 0x1fb   : > { %v291_v17 = vmax.f32 %v290_v16, 1e-12 }
 0x1fd   : > { %v292_v18 = vmin.f32 %v291_v17, 1e+12 }
 0x1ff   : > { %v294_v19 = vsel %vm293_vm4, %v292_v18, 0.0 }
 0x200   : > { %295 = vadd.xlane.f32.xlu1 %v294_v19 }
 0x289   : > { %v296_v20 = vpop.xlane.xlu1 %295 }
 0x28a   : > { %v297_v21 = vrot.slane %v296_v20, 4 }
 0x28c   : > { %v298_v22 = vadd.f32 %v297_v21, %v296_v20 }
 0x28e   : > { %v299_v23 = vrot.slane %v298_v22, 2 }
 0x290   : > { %v300_v24 = vadd.f32 %v299_v23, %v298_v22 }
 0x292   : > { %v301_v25 = vrot.slane %v300_v24, 1 }
 0x294   : > { %v302_v26 = vadd.f32 %v301_v25, %v300_v24 }
 0x296   : > { %428 = vpush %v302_v26 }
 0x2c7   : > { %s429_s27 = spop %428 }
 0x2c8   : > { %v304_v27 = vstv %s429_s27 }
 0x2c9   : > { %305 = vst [vmem:[%s189_s24] sm:$0xff] %v304_v27 }
 0x2ca   : > { %525 = shalt.err (!%p522_p0)
}
 0x2cb   : > { %s526_s8 = scalar_lea.hbm %s318_s30, 128  ;;  %s530_s11 = scalar_lea.hbm %s722_s3, 256 }
 0x2cc   : > { %p527_p1 = scmp.ne.s32.totalorder %s318_s30, %s526_s8  ;;  %p531_p4 = scmp.lt.s32.totalorder %s318_s30, %s722_s3 }
 0x2cd   : > { %p532_p7 = scmp.lt.s32.totalorder %s530_s11, %s526_s8 }
 0x2ce   : > { %p528_p2 = pnand %p527_p1, %p643_p5 }
 0x2cf   : > { %p533_p8 = por %p532_p7, %p531_p4 }
 0x2d0   : > { %p529_p3 = pneg %p528_p2 }
 0x2d2   : > { %p534_p6 = pnand %p533_p8, %p529_p3 }
 0x2d4   : > { %537 = shalt.err (!%p534_p6)
}
 0x2d5   : > { %434 = dma.vmem_to_hbm [thread:$0]  (%p643_p5), %s681_s25, 128, %s318_s30, %s307_s4  }
 0x2d6 PF: > { %p446_p9 = scmp.ge.s32.totalorder %s576_s15, 2  ;;  %s332_s20 = sand.u32 1, %s564_s12  }
 0x2d7   : > { %p726_p10 = scmp.ne.s32.totalorder %s724_s23, 0  ;;  %s333_s24 = scalar_lea.sflag [#allocation4], %s332_s20 }
 0x2d9   : > { %p441_p11 = pnand %p446_p9, %p726_p10 }
 0x2db   : > { %p442_p12 = pneg %p441_p11 }
 0x2dd   : > { %559 = dma.done.wait (%p442_p12), %s333_s24, 128  }
 0x2de   : > { %561 = vsyncadd (%p442_p12), %s333_s24, 4294967168  ;;  %p14_p13 = scmp.ge.s32.totalorder %s630_s18, 4   ;;  %s727_s12 = smov %s568_s13 }
 0x2df   : > { %s728_s13 = smov %s572_s14  ;;  %s729_s14 = smov %s641_s21 }
 0x2e0   : > { %s730_s15 = smov %s630_s18  ;;  %16 = sbr.rel (!%p14_p13) target bundleno = 4 (0x4), region = 75 }
 0x2e5   :  { %338 = vsyncpa [#allocation3], 1 }
 0x2e6   :  { %340 = vsyncpa [#allocation3 + $0x1], 1 }
 0x2e7   :  { %341 = vsyncpa [#allocation4], 1 }
 0x2e8   :  { %343 = vsyncpa [#allocation4 + $0x1], 1 }

</bundles_post_ra>
